<compile_context>
chip_gen: v7x
topology: tpu7x:2x2x1
jax: 0.10.0
libtpu: 0.0.40
codegen_flags: <defaults>
</compile_context>

<pallas_src>
import functools

import jax
import jax.numpy as jnp
from jax.experimental import pallas as pl
from jax.experimental.pallas import tpu as pltpu


def _mirt_kernel(theta_ref, a_ref, b_ref, out_ref):
    # theta_ref: (K, TB)  gathered, transposed student embeddings
    # a_ref    : (K, TB)  gathered, transposed sigmoid(discrimination)
    # b_ref    : (1, TB)  gathered exercise difficulties (lane-dense row)
    # out_ref  : (1, TB)  lane-dense output row
    theta = theta_ref[...].astype(jnp.float32)
    a = a_ref[...].astype(jnp.float32)                 # sigmoid already applied
    b = b_ref[...].astype(jnp.float32)
    s = jnp.sum(a * theta, axis=0, keepdims=True)      # (1, TB) sublane reduce
    # 1 / (1 + exp(-s + b))  ==  sigmoid(s - b)
    out_ref[...] = jax.nn.sigmoid(s - b)


def mirt_forward(student_id, exercise_id, theta_w, a_w, b_w, *, tb=8192):
    """student_id, exercise_id: int32 (B,). Returns float32 (B,)."""
    B = student_id.shape[0]
    K = theta_w.shape[1]

    # Clamp the tile to the 128-padded batch so small batches don't get padded
    # out to a full 8K tile; keep it a multiple of 128 (lane width).
    b_pad128 = ((B + 127) // 128) * 128
    tb = max(128, min(tb, b_pad128))
    nb = pl.cdiv(B, tb)                    # number of batch tiles
    b_pad = nb * tb
    pad = b_pad - B

    # Pad the cheap (B,) id vectors with a VALID index (0), not the gathered
    # (B, K) float arrays.  Padded tail columns are sliced off at the end.
    sid = student_id.astype(jnp.int32)
    eid = exercise_id.astype(jnp.int32)
    if pad:
        sid = jnp.pad(sid, (0, pad))
        eid = jnp.pad(eid, (0, pad))

    # Small-table preprocessing (S*K / E*K elements only):
    #   * sigmoid folded into the a table (commutes with the gather),
    #   * tables pre-transposed so the gather directly yields (K, B_pad).
    theta_t_tbl = theta_w.astype(jnp.float32).T            # (K, S)
    a_t_tbl = jax.nn.sigmoid(a_w.astype(jnp.float32)).T    # (K, E)
    b_row = b_w.astype(jnp.float32)[:, 0]                  # (E,)

    theta_t = jnp.take(theta_t_tbl, sid, axis=1)           # (K, B_pad)
    a_t = jnp.take(a_t_tbl, eid, axis=1)                   # (K, B_pad)
    b_2d = jnp.take(b_row, eid)[None, :]                   # (1, B_pad)

    grid_spec = pltpu.PrefetchScalarGridSpec(
        num_scalar_prefetch=0,
        grid=(nb,),
        in_specs=[
            pl.BlockSpec((K, tb), lambda i: (0, i)),
            pl.BlockSpec((K, tb), lambda i: (0, i)),
            pl.BlockSpec((1, tb), lambda i: (0, i)),
        ],
        out_specs=pl.BlockSpec((1, tb), lambda i: (0, i)),
    )

    out = pl.pallas_call(
        _mirt_kernel,
        grid_spec=grid_spec,
        out_shape=jax.ShapeDtypeStruct((1, b_pad), jnp.float32),
        compiler_params=pltpu.CompilerParams(
            dimension_semantics=("parallel",),
            vmem_limit_bytes=64 << 20,
        ),
    )(theta_t, a_t, b_2d)

    return out[0, :B]


def mirt_reference(student_id, exercise_id, theta_w, a_w, b_w):
    theta = theta_w[student_id]                       # (B, K)
    a = jax.nn.sigmoid(a_w[exercise_id])              # (B, K)
    b = b_w[exercise_id][:, 0]                        # (B,)
    return 1.0 / (1.0 + jnp.exp(-jnp.sum(a * theta, axis=-1) + b))


if __name__ == "__main__":
    student_num, exercise_num, knowledge_num = 10, 20, 32

    key = jax.random.PRNGKey(0)
    k1, k2, k3, k4, k5 = jax.random.split(key, 5)

    # nn.Embedding default init: N(0, 1)
    theta_w = jax.random.normal(k1, (student_num, knowledge_num), jnp.float32)
    a_w = jax.random.normal(k2, (exercise_num, knowledge_num), jnp.float32)
    b_w = jax.random.normal(k3, (exercise_num, 1), jnp.float32)

    fwd = jax.jit(functools.partial(mirt_forward))
    fwd_small_tile = jax.jit(functools.partial(mirt_forward, tb=128))

    # Test 1: tiny batch (single tile, heavy clamping path).
    batch = 8
    student_id = jax.random.randint(k4, (batch,), 0, student_num, jnp.int32)
    exercise_id = jax.random.randint(k5, (batch,), 0, exercise_num, jnp.int32)
    out = jax.block_until_ready(fwd(student_id, exercise_id, theta_w, a_w, b_w))
    ref = mirt_reference(student_id, exercise_id, theta_w, a_w, b_w)
    assert out.shape == (batch,)
    assert jnp.allclose(out, ref, atol=1e-5, rtol=1e-5)

    # Test 2: multi-tile path with B % tb != 0 (nb = 3, padded tail).
    batch2 = 300
    k6, k7 = jax.random.split(k5)
    student_id2 = jax.random.randint(k6, (batch2,), 0, student_num, jnp.int32)
    exercise_id2 = jax.random.randint(k7, (batch2,), 0, exercise_num, jnp.int32)
    out2 = jax.block_until_ready(
        fwd_small_tile(student_id2, exercise_id2, theta_w, a_w, b_w))
    ref2 = mirt_reference(student_id2, exercise_id2, theta_w, a_w, b_w)
    assert out2.shape == (batch2,)
    assert jnp.allclose(out2, ref2, atol=1e-5, rtol=1e-5)

    print("KERNEL_OK")
</pallas_src>

<mosaic_0001>
module attributes {stable_mosaic.version = 11 : i64} {
  func.func @_mirt_kernel(%arg0: i32, %arg1: memref<32x128xf32, #tpu.memory_space<vmem>>, %arg2: memref<32x128xf32, #tpu.memory_space<vmem>>, %arg3: memref<1x128xf32, #tpu.memory_space<vmem>>, %arg4: memref<1x128xf32, #tpu.memory_space<vmem>>) attributes {dimension_semantics = [#tpu.dimension_semantics<parallel>], iteration_bounds = array<i64: 1>, scalar_prefetch = 0 : i64, scratch_operands = 0 : i64, tpu.core_type = #tpu.core_type<tc>, window_params = [{transform_indices = @transform_0, window_bounds = array<i64: 32, 128>}, {transform_indices = @transform_1, window_bounds = array<i64: 32, 128>}, {transform_indices = @transform_2, window_bounds = array<i64: 1, 128>}, {transform_indices = @transform_3, window_bounds = array<i64: 1, 128>}]} {
    %c0 = arith.constant 0 : index
    %c0_0 = arith.constant 0 : index
    %0 = vector.load %arg1[%c0, %c0_0] : memref<32x128xf32, #tpu.memory_space<vmem>>, vector<32x128xf32>
    %c0_1 = arith.constant 0 : index
    %c0_2 = arith.constant 0 : index
    %1 = vector.load %arg2[%c0_1, %c0_2] : memref<32x128xf32, #tpu.memory_space<vmem>>, vector<32x128xf32>
    %c0_3 = arith.constant 0 : index
    %c0_4 = arith.constant 0 : index
    %2 = vector.load %arg3[%c0_3, %c0_4] : memref<1x128xf32, #tpu.memory_space<vmem>>, vector<1x128xf32>
    %3 = arith.mulf %1, %0 : vector<32x128xf32>
    %cst = arith.constant dense<0.000000e+00> : vector<128xf32>
    %4 = vector.multi_reduction <add>, %3, %cst [0] : vector<32x128xf32> to vector<128xf32>
    %5 = vector.shape_cast %4 : vector<128xf32> to vector<1x128xf32>
    %6 = arith.subf %5, %2 : vector<1x128xf32>
    %7 = arith.negf %6 : vector<1x128xf32>
    %8 = math.exp %7 : vector<1x128xf32>
    %cst_5 = arith.constant 1.000000e+00 : f32
    %9 = vector.broadcast %cst_5 : f32 to vector<1x128xf32>
    %10 = arith.addf %9, %8 : vector<1x128xf32>
    %11 = arith.divf %9, %10 : vector<1x128xf32>
    %c0_6 = arith.constant 0 : index
    %c0_7 = arith.constant 0 : index
    %12 = vector.load %arg4[%c0_6, %c0_7] : memref<1x128xf32, #tpu.memory_space<vmem>>, vector<1x128xf32>
    tpu.vector_store %arg4[%c0_6, %c0_7], %11 {strides = array<i32>} : memref<1x128xf32, #tpu.memory_space<vmem>>, vector<1x128xf32>,
    return
  }
  func.func @transform_0(%arg0: i32) -> (i32, i32) {
    %c0_i32 = arith.constant 0 : i32
    %c0_i32_0 = arith.constant 0 : i32
    return %c0_i32, %arg0 : i32, i32
  }
  func.func @transform_1(%arg0: i32) -> (i32, i32) {
    %c0_i32 = arith.constant 0 : i32
    %c0_i32_0 = arith.constant 0 : i32
    return %c0_i32, %arg0 : i32, i32
  }
  func.func @transform_2(%arg0: i32) -> (i32, i32) {
    %c0_i32 = arith.constant 0 : i32
    %c0_i32_0 = arith.constant 0 : i32
    return %c0_i32, %arg0 : i32, i32
  }
  func.func @transform_3(%arg0: i32) -> (i32, i32) {
    %c0_i32 = arith.constant 0 : i32
    %c0_i32_0 = arith.constant 0 : i32
    return %c0_i32, %arg0 : i32, i32
  }
}

</mosaic_0001>

<bundles_post_ra>
// kernel: mirt_forward.1
= control target key start
LH: loop header
LB: loop body
LE: loop exit
PB: predicated region body
PF: predicated region fallthrough
CT: control target
= control target key end

     0   :  { %8 = vsyncpa [#allocation3], 0  ;;  %s286_s0 = inlined_call_operand.hbm [shape: f32[32,128], index: 0, kind: input, shape index: {}]   ;;  %s287_s1 = inlined_call_operand.hbm [shape: f32[32,128], index: 1, kind: input, shape index: {}]   ;;  %s288_s2 = inlined_call_operand.hbm [shape: f32[1,128], index: 2, kind: input, shape index: {}]   ;;  %s289_s3 = inlined_call_operand.hbm [shape: f32[1,128], index: 3, kind: output, shape index: {}]  }
   0x1   :  { %9 = vsyncpa [#allocation6], 0 }
   0x2   :  { %10 = vsyncpa [#allocation4], 0  ;;  %s205_s12 = smov [#allocation5]   ;;  %s206_s14 = smov [#allocation2]  }
   0x3   :  { %s28_s13 = sshll.u32 %s205_s12, 4  ;;  %s16_s15 = sshll.u32 %s206_s14, 4  ;;  %s29_s13 = int_to_ptr.vmem [resolvable:$true] %s28_s13  ;;  %s231_s15 = int_to_ptr.vmem [resolvable:$true] %s16_s15 }
   0x4   :  { %s111_s18 = scalar_lea.hbm %s287_s1, 512 }
   0x5   :  { %p112_p0 = scmp.ne.s32.totalorder %s287_s1, %s111_s18  ;;  %p115_p1 = scmp.lt.u32.totalorder %s111_s18, %s287_s1 }
   0x7   :  { %p117_p2 = pnand %p115_p1, %p112_p0 }
   0x9   :  { %120 = shalt.err (!%p117_p2)
}
   0xa   :  { %s121_s23 = scalar_lea.vmem %s29_s13, 512  ;;  %p126_p4 = scmp.lt.s32.totalorder %s29_s13, %s29_s13 }
   0xb   :  { %p122_p3 = scmp.ne.s32.totalorder %s29_s13, %s121_s23  ;;  %p127_p5 = scmp.lt.s32.totalorder %s121_s23, %s121_s23 }
   0xd   :  { %p128_p6 = por %p127_p5, %p126_p4 }
   0xf   :  { %p129_p7 = pnand %p128_p6, %p122_p3 }
  0x11   :  { %132 = shalt.err (!%p129_p7)
}
  0x12   :  { %s207_s24 = smov 128   ;;  %s208_s25 = smov 8  }
  0x13   :  { %34 = dma.hbm_to_vmem [thread:$0]  %s287_s1, 512, %s29_s13, [#allocation6], %s207_s24, %s207_s24, %s208_s25  }
  0x14   :  { %s133_s30 = scalar_lea.hbm %s286_s0, 512 }
  0x15   :  { %p134_p8 = scmp.ne.s32.totalorder %s286_s0, %s133_s30  ;;  %p137_p9 = scmp.lt.u32.totalorder %s133_s30, %s286_s0 }
  0x17   :  { %p139_p10 = pnand %p137_p9, %p134_p8 }
  0x19   :  { %142 = shalt.err (!%p139_p10)
}
  0x1a   :  { %s143_s8 = scalar_lea.vmem %s231_s15, 512  ;;  %p148_p12 = scmp.lt.s32.totalorder %s231_s15, %s231_s15 }
  0x1b   :  { %p144_p11 = scmp.ne.s32.totalorder %s231_s15, %s143_s8  ;;  %p149_p13 = scmp.lt.s32.totalorder %s143_s8, %s143_s8 }
  0x1d   :  { %p150_p0 = por %p149_p13, %p148_p12 }
  0x1f   :  { %p151_p1 = pnand %p150_p0, %p144_p11 }
  0x21   :  { %154 = shalt.err (!%p151_p1)
}
  0x22   :  { %22 = dma.hbm_to_vmem [thread:$0]  %s286_s0, 512, %s231_s15, [#allocation3], %s207_s24, %s207_s24, %s208_s25  }
  0x23   :  { %s209_s10 = smov [#allocation7]   ;;  %s155_s14 = scalar_lea.hbm %s288_s2, 16 }
  0x24   :  { %s41_s11 = sshll.u32 %s209_s10, 4  ;;  %p156_p2 = scmp.ne.s32.totalorder %s288_s2, %s155_s14  ;;  %s42_s11 = int_to_ptr.vmem [resolvable:$true] %s41_s11 }
  0x25   :  { %p159_p3 = scmp.lt.u32.totalorder %s155_s14, %s288_s2 }
  0x27   :  { %p161_p4 = pnand %p159_p3, %p156_p2 }
  0x29   :  { %164 = shalt.err (!%p161_p4)
}
  0x2a   :  { %s165_s20 = scalar_lea.vmem %s42_s11, 16  ;;  %s169_s0 = scalar_lea.vmem %s42_s11, 32 }
  0x2b   :  { %p166_p5 = scmp.ne.s32.totalorder %s42_s11, %s165_s20  ;;  %p170_p6 = scmp.lt.s32.totalorder %s42_s11, %s42_s11 }
  0x2c   :  { %p171_p7 = scmp.lt.s32.totalorder %s169_s0, %s165_s20 }
  0x2e   :  { %p172_p8 = por %p171_p7, %p170_p6 }
  0x30   :  { %p173_p9 = pnand %p172_p8, %p166_p5 }
  0x32   :  { %176 = shalt.err (!%p173_p9)
}
  0x33   :  { %44 = dma.hbm_to_vmem [thread:$0]  %s288_s2, 16, %s42_s11, [#allocation6]  }
  0x34   :  { %199 = dma.done.wait [#allocation3], 512  }
  0x35   :  { %200 = vsyncadd [#allocation3], 4294966784 }
  0x36   :  { %201 = dma.done.wait [#allocation6], 528  }
  0x37   :  { %202 = vsyncadd [#allocation6], 4294966768  ;;  %v54_v0 = vld [vmem:[#allocation2] sm:$0xff]  ;;  %v55_v1 = vld [vmem:[#allocation2 + $0x8] sm:$0xff]  ;;  %s210_s2 = smov [#allocation8]  }
  0x38   :  { %v56_v2 = vld [vmem:[#allocation2 + $0x10] sm:$0xff]  ;;  %v57_v3 = vld [vmem:[#allocation2 + $0x18] sm:$0xff]  ;;  %v58_v4 = vld [vmem:[#allocation5] sm:$0xff]  ;;  %s90_s22 = sshll.u32 %s210_s2, 4  ;;  %s91_s22 = int_to_ptr.vmem [resolvable:$true] %s90_s22 }
  0x39   :  { %v59_v5 = vld [vmem:[#allocation5 + $0x8] sm:$0xff]  ;;  %v60_v6 = vld [vmem:[#allocation5 + $0x10] sm:$0xff]  ;;  %v61_v7 = vld [vmem:[#allocation5 + $0x18] sm:$0xff]  ;;  %v63_v8 = vmul.f32 %v58_v4, %v54_v0  ;;  %s177_s23 = scalar_lea.vmem %s91_s22, 16  ;;  %s181_s24 = scalar_lea.vmem %s91_s22, 32 }
  0x3a   :  { %v64_v9 = vmul.f32 %v59_v5, %v55_v1  ;;  %v65_v10 = vmul.f32 %v60_v6, %v56_v2  ;;  %v66_v11 = vmul.f32 %v61_v7, %v57_v3  ;;  %v62_v20 = vld [vmem:[#allocation7] sm:$0x1]  ;;  %p178_p10 = scmp.ne.s32.totalorder %s91_s22, %s177_s23  ;;  %p182_p11 = scmp.lt.s32.totalorder %s91_s22, %s91_s22 }
  0x3b   :  { %p183_p12 = scmp.lt.s32.totalorder %s181_s24, %s177_s23 }
  0x3c   :  { %v67_v12 = vadd.f32 %v64_v9, %v63_v8 }
  0x3d   :  { %p184_p13 = por %p183_p12, %p182_p11 }
  0x3e   :  { %v68_v13 = vadd.f32 %v67_v12, %v65_v10 }
  0x3f   :  { %p185_p0 = pnand %p184_p13, %p178_p10 }
  0x40   :  { %v69_v14 = vadd.f32 %v68_v13, %v66_v11 }
  0x42   :  { %v70_v15 = vrot.slane %v69_v14, 4 }
  0x44   :  { %v71_v16 = vadd.f32 %v70_v15, %v69_v14 }
  0x46   :  { %v72_v17 = vrot.slane %v71_v16, 2 }
  0x48   :  { %v73_v18 = vadd.f32 %v72_v17, %v71_v16 }
  0x4a   :  { %v74_v19 = vrot.slane %v73_v18, 1 }
  0x4c   :  { %v75_v21 = vadd.f32 %v74_v19, %v73_v18 }
  0x4e   :  { %v76_v22 = vsub.f32 %v75_v21, %v62_v20 }
  0x50   :  { %v100_v23 = vmul.f32 -1.442695, %v76_v22 }
  0x52   :  { %107 = vpow2.f32 %v100_v23 }
  0x5c   :  { %v108_v24 = vpop.eup %107 }
  0x5d   :  { %v80_v25 = vadd.f32 1.0, %v108_v24 }
  0x5f   :  { %109 = vrcp.f32 %v80_v25 }
  0x69   :  { %v110_v26 = vpop.eup %109 }
  0x6a   :  { %83 = vst [vmem:[#allocation8] sm:$0x1] %v110_v26 }
  0x6b   :  { %188 = shalt.err (!%p185_p0)
}
  0x6c   :  { %s189_s27 = scalar_lea.hbm %s289_s3, 16 }
  0x6d   :  { %p190_p1 = scmp.ne.s32.totalorder %s289_s3, %s189_s27  ;;  %p193_p2 = scmp.lt.u32.totalorder %s189_s27, %s289_s3 }
  0x6f   :  { %p195_p3 = pnand %p193_p2, %p190_p1 }
  0x71   :  { %198 = shalt.err (!%p195_p3)
}
  0x72   :  { %93 = dma.vmem_to_hbm [thread:$0]  %s91_s22, 16, %s289_s3, [#allocation4]  }
  0x73   :  { %203 = dma.done.wait [#allocation4], 16  }
  0x74   :  { %204 = vsyncadd [#allocation4], 4294967280 }
  0x75   :  { %97 = vsyncpa [#allocation3], 1 }
  0x76   :  { %98 = vsyncpa [#allocation6], 1 }
  0x77   :  { %99 = vsyncpa [#allocation4], 1 }

</bundles_post_ra>
